<compile_context>
chip_gen: v5e
topology: v5e:2x2
jax: 0.10.0
libtpu: 0.0.40
codegen_flags: <defaults>
</compile_context>

<pallas_src>
import jax
import jax.numpy as jnp
from jax.experimental import pallas as pl
from jax.experimental.pallas import tpu as pltpu


# --------------------------------------------------------------------------------------
# Kernel: one batch tile per grid step. Single streamed input (enc) + a tiny weight.
# --------------------------------------------------------------------------------------
def attention_kernel(enc_ref, wh_ref, out_ref):
    enc = enc_ref[...]                                        # (TB, S, H), native dtype
    w_col = wh_ref[...]                                       # (H, 1),     native dtype
    TB = enc.shape[0]

    # Scores as (TB, S, 1): batched contraction over the lane (H) axis, f32 accumulation.
    # Keeping the trailing singleton keeps S on sublanes (no relayout before the softmax).
    w_b = jnp.broadcast_to(w_col[None], (TB,) + w_col.shape)  # (TB, H, 1), tiny
    scores = jnp.einsum("bsh,bhk->bsk", enc, w_b,
                        preferred_element_type=jnp.float32)   # (TB, S, 1)

    # Max-stabilized softmax over the sequence (sublane) axis. Exact divide (no approx
    # reciprocal) so the result matches the reference softmax closely.
    m = jnp.max(scores, axis=1, keepdims=True)                # (TB, 1, 1)
    e = jnp.exp(scores - m)                                   # (TB, S, 1)
    alphas = e / jnp.sum(e, axis=1, keepdims=True)            # (TB, S, 1)

    # attention[b, h] = sum_s alphas[b, s] * enc[b, s, h] as a fused batched contraction:
    # no (TB, S, H) f32 product is materialized.
    att = jnp.einsum("bsk,bsh->bkh", alphas.astype(enc.dtype), enc,
                     preferred_element_type=jnp.float32)      # (TB, 1, H)
    out_ref[...] = att[:, 0, :].astype(out_ref.dtype)


# --------------------------------------------------------------------------------------
# Wrapper
# --------------------------------------------------------------------------------------
def fold_params(params, dtype):
    """Collapse the 3 activation-free Linears into one effective (H -> 1) projection.

    The z-half of W1 and all biases are constant over the sequence axis, so they cancel
    exactly under the softmax and are dropped.
    """
    w1h, _w1z, _b1, w2, _b2, w3, _b3 = params
    w_col = jnp.dot(w1h, jnp.dot(w2, w3))                     # (H, 1)
    return w_col.astype(dtype)


def _choose_batch_tile(B, S, H, itemsize, max_tile_bytes=8 << 20):
    """Pick the batch tile: ~8 MiB enc tile per buffer (double-buffered by Pallas)."""
    row_bytes = max(1, S * H * itemsize)
    max_rows = max(1, max_tile_bytes // row_bytes)
    if B <= max_rows:
        return B                                              # full batch -> full-array blocks
    tb = (max_rows // 8) * 8                                  # keep 2-D out block 8-aligned
    if tb == 0:
        # TODO(synk): for very long sequences (one batch row exceeds the tile budget) add an
        # S-tiled flash-style online-softmax path instead of clamping to TB=8.
        tb = 8
    return min(tb, B)


def attention_forward(encoder_outputs, decoder_hidden, params):
    """encoder_outputs: (B, S, H) [batch-first, as in PyTorch]; decoder_hidden: (L, B, H).

    decoder_hidden contributes a per-batch constant to every sequence position's score,
    which cancels exactly under the softmax, so it is not needed inside the kernel.
    """
    del decoder_hidden
    B, S, H = encoder_outputs.shape
    w_col = fold_params(params, encoder_outputs.dtype)        # (H, 1)

    itemsize = jnp.dtype(encoder_outputs.dtype).itemsize
    TB = _choose_batch_tile(B, S, H, itemsize)
    grid = (pl.cdiv(B, TB),)                                  # partial last tile padded/masked

    grid_spec = pltpu.PrefetchScalarGridSpec(
        num_scalar_prefetch=0,
        grid=grid,
        in_specs=[
            pl.BlockSpec((TB, S, H), lambda b: (b, 0, 0)),    # streamed enc tile (batch-major)
            pl.BlockSpec((H, 1), lambda b: (0, 0)),           # folded projection weight
        ],
        out_specs=pl.BlockSpec((TB, H), lambda b: (b, 0)),
    )

    return pl.pallas_call(
        attention_kernel,
        out_shape=jax.ShapeDtypeStruct((B, H), encoder_outputs.dtype),
        grid_spec=grid_spec,
        compiler_params=pltpu.CompilerParams(
            dimension_semantics=("parallel",),                # megacore-shard batch on v7x
            vmem_limit_bytes=48 * 1024 * 1024,                # headroom on v7x's 64 MiB VMEM
        ),
    )(encoder_outputs, w_col)


# --------------------------------------------------------------------------------------
# Params + pure-JAX reference (uses the ORIGINAL un-folded 3-Linear stack, incl. z/biases).
# --------------------------------------------------------------------------------------
def make_params(key, hid_dim):
    """Deterministic init mimicking nn.Linear shapes (stored transposed: in x out)."""
    H = hid_dim
    ks = jax.random.split(key, 6)
    w1 = jax.random.normal(ks[0], (2 * H, 4 * H), jnp.float32) * 0.05
    b1 = jax.random.normal(ks[1], (1, 4 * H), jnp.float32) * 0.05
    w2 = jax.random.normal(ks[2], (4 * H, 2 * H), jnp.float32) * 0.05
    b2 = jax.random.normal(ks[3], (1, 2 * H), jnp.float32) * 0.05
    w3 = jax.random.normal(ks[4], (2 * H, 1), jnp.float32) * 0.05
    b3 = jax.random.normal(ks[5], (1, 1), jnp.float32) * 0.05
    w1h, w1z = w1[:H], w1[H:]
    return (w1h, w1z, b1, w2, b2, w3, b3)


def attention_ref(encoder_outputs, decoder_hidden, params):
    """Pure-JAX reference replicating the PyTorch forward (full Linear stack, z included)."""
    w1h, w1z, b1, w2, b2, w3, b3 = params
    enc = jnp.transpose(encoder_outputs, (1, 0, 2))           # (S, B, H), matches .permute(1,0,2)
    z = decoder_hidden[-1]                                    # (B, H)
    S, B, H = enc.shape
    x = jnp.concatenate([enc, jnp.broadcast_to(z, (S, B, H))], axis=-1)   # (S, B, 2H)
    w1 = jnp.concatenate([w1h, w1z], axis=0)                  # (2H, 4H)
    t = x @ w1 + b1
    t = t @ w2 + b2
    scores = (t @ w3 + b3)[..., 0]                            # (S, B)
    alphas = jax.nn.softmax(scores, axis=0)
    return jnp.sum(alphas[:, :, None] * enc, axis=0)          # (B, H)


if __name__ == "__main__":
    B, S, H, L = 2, 8, 32, 1

    key = jax.random.PRNGKey(0)
    k_enc, k_dec, k_par = jax.random.split(key, 3)
    encoder_outputs = jax.random.normal(k_enc, (B, S, H), jnp.float32)
    decoder_hidden = jax.random.normal(k_dec, (L, B, H), jnp.float32)
    params = make_params(k_par, H)

    out = attention_forward(encoder_outputs, decoder_hidden, params)
    out = jax.block_until_ready(out)

    ref = attention_ref(encoder_outputs, decoder_hidden, params)
    assert out.shape == (B, H)
    assert out.dtype == encoder_outputs.dtype
    assert jnp.allclose(out, ref, atol=1e-3, rtol=1e-3)

    print("KERNEL_OK")
</pallas_src>

<mosaic_0001>
module attributes {stable_mosaic.version = 11 : i64} {
  func.func @attention_kernel(%arg0: i32, %arg1: memref<2x8x32xf32, #tpu.memory_space<vmem>>, %arg2: memref<32x1xf32, #tpu.memory_space<vmem>>, %arg3: memref<2x32xf32, #tpu.memory_space<vmem>>) attributes {dimension_semantics = [#tpu.dimension_semantics<parallel>], iteration_bounds = array<i64: 1>, scalar_prefetch = 0 : i64, scratch_operands = 0 : i64, tpu.core_type = #tpu.core_type<tc>, window_params = [{transform_indices = @transform_0, window_bounds = array<i64: 2, 8, 32>}, {pipeline_mode = #tpu.pipeline_mode<synchronous>, transform_indices = @transform_1, window_bounds = array<i64: 32, 1>}, {transform_indices = @transform_2, window_bounds = array<i64: 2, 32>}]} {
    %c0 = arith.constant 0 : index
    %c0_0 = arith.constant 0 : index
    %c0_1 = arith.constant 0 : index
    %0 = vector.load %arg1[%c0, %c0_0, %c0_1] : memref<2x8x32xf32, #tpu.memory_space<vmem>>, vector<2x8x32xf32>
    %c0_2 = arith.constant 0 : index
    %c0_3 = arith.constant 0 : index
    %1 = vector.load %arg2[%c0_2, %c0_3] : memref<32x1xf32, #tpu.memory_space<vmem>>, vector<32x1xf32>
    %2 = vector.shape_cast %1 : vector<32x1xf32> to vector<1x32x1xf32>
    %3 = vector.shape_cast %2 : vector<1x32x1xf32> to vector<1x32x1xf32>
    %4 = vector.broadcast %3 : vector<1x32x1xf32> to vector<2x32x1xf32>
    "tpu.trace_start"() <{level = 10 : i32, message = "bsh,bhk->bsk"}> : () -> ()
    %cst = arith.constant dense<0.000000e+00> : vector<2x8x1xf32>
    %5 = tpu.matmul %0, %4, %cst {dimension_numbers = #tpu.dot_dimension_numbers<[2], [1], [1], [2], [0, 0, 0, 1, 1, 2], [0], [0]>} : vector<2x8x32xf32>, vector<2x32x1xf32>, vector<2x8x1xf32> -> vector<2x8x1xf32>
    "tpu.trace_stop"() : () -> ()
    %cst_4 = arith.constant dense<0xFF800000> : vector<2x1xf32>
    %6 = vector.multi_reduction <maximumf>, %5, %cst_4 [1] : vector<2x8x1xf32> to vector<2x1xf32>
    %7 = vector.shape_cast %6 : vector<2x1xf32> to vector<2x1x1xf32>
    %8 = vector.broadcast %7 : vector<2x1x1xf32> to vector<2x8x1xf32>
    %9 = arith.subf %5, %8 : vector<2x8x1xf32>
    %10 = math.exp %9 : vector<2x8x1xf32>
    %cst_5 = arith.constant dense<0.000000e+00> : vector<2x1xf32>
    %11 = vector.multi_reduction <add>, %10, %cst_5 [1] : vector<2x8x1xf32> to vector<2x1xf32>
    %12 = vector.shape_cast %11 : vector<2x1xf32> to vector<2x1x1xf32>
    %13 = vector.broadcast %12 : vector<2x1x1xf32> to vector<2x8x1xf32>
    %14 = arith.divf %10, %13 : vector<2x8x1xf32>
    "tpu.trace_start"() <{level = 10 : i32, message = "bsk,bsh->bkh"}> : () -> ()
    %cst_6 = arith.constant dense<0.000000e+00> : vector<2x1x32xf32>
    %15 = tpu.matmul %14, %0, %cst_6 {dimension_numbers = #tpu.dot_dimension_numbers<[1], [1], [2], [2], [0, 0, 0, 2, 1, 2], [0], [0]>} : vector<2x8x1xf32>, vector<2x8x32xf32>, vector<2x1x32xf32> -> vector<2x1x32xf32>
    "tpu.trace_stop"() : () -> ()
    %16 = vector.shape_cast %15 : vector<2x1x32xf32> to vector<2x32xf32>
    %c0_7 = arith.constant 0 : index
    %c0_8 = arith.constant 0 : index
    %17 = vector.load %arg3[%c0_7, %c0_8] : memref<2x32xf32, #tpu.memory_space<vmem>>, vector<2x32xf32>
    tpu.vector_store %arg3[%c0_7, %c0_8], %16 {strides = array<i32>} : memref<2x32xf32, #tpu.memory_space<vmem>>, vector<2x32xf32>,
    return
  }
  func.func @transform_0(%arg0: i32) -> (i32, i32, i32) {
    %c0_i32 = arith.constant 0 : i32
    %c0_i32_0 = arith.constant 0 : i32
    %c0_i32_1 = arith.constant 0 : i32
    return %arg0, %c0_i32, %c0_i32_0 : i32, i32, i32
  }
  func.func @transform_1(%arg0: i32) -> (i32, i32) {
    %c0_i32 = arith.constant 0 : i32
    %c0_i32_0 = arith.constant 0 : i32
    %c0_i32_1 = arith.constant 0 : i32
    return %c0_i32, %c0_i32_0 : i32, i32
  }
  func.func @transform_2(%arg0: i32) -> (i32, i32) {
    %c0_i32 = arith.constant 0 : i32
    %c0_i32_0 = arith.constant 0 : i32
    return %arg0, %c0_i32 : i32, i32
  }
}

</mosaic_0001>

<bundles_post_ra>
// kernel: tpu_custom_call.1
= control target key start
LH: loop header
LB: loop body
LE: loop exit
PB: predicated region body
PF: predicated region fallthrough
CT: control target
= control target key end

     0   :  { %s346_s0 = inlined_call_operand.vmem [shape: f32[2,8,32], index: 0, kind: input, shape index: {}]   ;;  %s347_s1 = inlined_call_operand.vmem [shape: f32[32,1], index: 1, kind: input, shape index: {}]   ;;  %s348_s2 = inlined_call_operand.hbm [shape: f32[2,32], index: 2, kind: output, shape index: {}]  }
   0x1   :  { %v17_v0 = vld [vmem:[%s347_s1 + $0x18] sm:$0xff]  ;;  %v16_v1 = vld [vmem:[%s347_s1 + $0x10] sm:$0xff]  ;;  %v12_v2 = vld [vmem:[%s346_s0] sm:$0xff] }
   0x2   :  { %34 = vmatpush.msra.mxu0 %v17_v0  ;;  %57 = vmatpush.msra.mxu1 %v17_v0  ;;  %v13_v3 = vld [vmem:[%s346_s0 + $0x8] sm:$0xff] }
   0x3   :  { %v15_v4 = vld [vmem:[%s347_s1 + $0x8] sm:$0xff]  ;;  %236 = vmatpush.msra.mxu3 %v13_v3  ;;  %181 = vmatpush.msra.mxu2 %v12_v2 }
   0x4   :  { %7 = vsyncpa [#allocation3], 0  ;;  %35 = vmatpush.msra.mxu0 %v16_v1  ;;  %58 = vmatpush.msra.mxu1 %v16_v1  ;;  %v14_v5 = vld [vmem:[%s347_s1] sm:$0xff]  ;;  %vm18_vm0 = vcmask 261120   ;;  %vm65_vm1 = vcmask 7168   ;;  %vm162_vm10 = vcmask 64512  }
   0x5   :  { %s305_s0 = smov [#allocation2]   ;;  %s256_s23 = sshll.u32 %s348_s2, 4  ;;  %vm244_vm11 = vcmask 1041409   ;;  %vm247_vm12 = vcmask 254976   ;;  %s257_s23 = int_to_ptr.hbm [resolvable:$true] %s256_s23 }
   0x6   :  { %36 = vmatpush.msra.mxu0 %v15_v4  ;;  %59 = vmatpush.msra.mxu1 %v15_v4  ;;  %s254_s1 = sshll.u32 %s305_s0, 4  ;;  %s255_s1 = int_to_ptr.vmem [resolvable:$true] %s254_s1 }
   0x8   :  { %37 = vmatpush.msra.mxu0 %v14_v5  ;;  %60 = vmatpush.msra.mxu1 %v14_v5 }
   0x9   :  { %265 = vmatmul.msk.f32.vlgmr.msra.gmra.mxu0 %vm18_vm0, %v12_v2  ;;  %266 = vmatmul.msk.f32.vlgmr.msra.gmra.mxu1 %vm18_vm0, %v13_v3 }
  0x86   :  { %v39_v6 = vpop.f32.mrf.mxu0  ;;  %v62_v7 = vpop.f32.mrf.mxu1 }
  0x87   :  { %v66_v8 = vsel %vm65_vm1, %v39_v6, -inf  ;;  %v73_v9 = vsel %vm65_vm1, %v62_v7, -inf }
  0x88   :  { %v67_v10 = vrot.slane %v66_v8, 4  ;;  %v74_v11 = vrot.slane %v73_v9, 4 }
  0x8a   :  { %v68_v12 = vmax.f32 %v66_v8, %v67_v10  ;;  %v75_v13 = vmax.f32 %v73_v9, %v74_v11 }
  0x8c   :  { %v69_v14 = vrot.slane %v68_v12, 2  ;;  %v76_v15 = vrot.slane %v75_v13, 2 }
  0x8e   :  { %v70_v16 = vmax.f32 %v68_v12, %v69_v14  ;;  %v77_v17 = vmax.f32 %v75_v13, %v76_v15 }
  0x90   :  { %v71_v18 = vrot.slane %v70_v16, 1  ;;  %v78_v19 = vrot.slane %v77_v17, 1 }
  0x92   :  { %v72_v20 = vmax.f32 %v70_v16, %v71_v18  ;;  %v79_v21 = vmax.f32 %v77_v17, %v78_v19 }
  0x94   :  { %v80_v22 = vsub.f32 %v39_v6, %v72_v20  ;;  %v81_v23 = vsub.f32 %v62_v7, %v79_v21 }
  0x96   :  { %v82_v24 = vmul.f32 1.442695, %v80_v22  ;;  %v84_v25 = vmul.f32 1.442695, %v81_v23 }
  0x98   :  { %271 = vpow2.f32 %v82_v24 }
  0x99   :  { %273 = vpow2.f32 %v84_v25 }
  0x9e   :  { %v272_v26 = vpop.eup %271 }
  0x9f   :  { %v274_v27 = vpop.eup %273  ;;  %v86_v28 = vsel %vm65_vm1, %v272_v26, 0.0 }
  0xa0   :  { %v87_v29 = vrot.slane %v86_v28, 4  ;;  %v93_v30 = vsel %vm65_vm1, %v274_v27, 0.0 }
  0xa1   :  { %v94_v31 = vrot.slane %v93_v30, 4 }
  0xa2   :  { %v88_v32 = vadd.f32 %v87_v29, %v86_v28 }
  0xa3   :  { %v95_v33 = vadd.f32 %v94_v31, %v93_v30 }
  0xa4   :  { %v89_v34 = vrot.slane %v88_v32, 2 }
  0xa5   :  { %v96_v35 = vrot.slane %v95_v33, 2 }
  0xa6   :  { %v90_v36 = vadd.f32 %v89_v34, %v88_v32 }
  0xa7   :  { %v97_v37 = vadd.f32 %v96_v35, %v95_v33 }
  0xa8   :  { %v91_v38 = vrot.slane %v90_v36, 1 }
  0xa9   :  { %v98_v39 = vrot.slane %v97_v37, 1 }
  0xaa   :  { %v92_v40 = vadd.f32 %v91_v38, %v90_v36 }
  0xab   :  { %v99_v41 = vadd.f32 %v98_v39, %v97_v37 }
  0xac   :  { %275 = vrcp.f32 %v92_v40  ;;  %v111_v57 = vand.u32 2147483648, %v92_v40  ;;  %vm105_vm7 = vweird.f32 %v92_v40  ;;  %v109_v59 = vand.u32 2147483647, %v92_v40 }
  0xad   :  { %277 = vrcp.f32 %v99_v41  ;;  %v126_v48 = vand.u32 2147483648, %v99_v41  ;;  %v124_v50 = vand.u32 2147483647, %v99_v41  ;;  %vm120_vm3 = vweird.f32 %v99_v41 }
  0xae   :  { %v112_v61 = vor.u32 1.1754944e-38, %v111_v57  ;;  %vm110_vm9 = vcmp.eq.f32.partialorder %v109_v59, 8.507059e+37 }
  0xaf   :  { %v127_v53 = vor.u32 1.1754944e-38, %v126_v48  ;;  %vm125_vm5 = vcmp.eq.f32.partialorder %v124_v50, 8.507059e+37 }
  0xb2   :  { %v276_v42 = vpop.eup %275 }
  0xb3   :  { %v278_v43 = vpop.eup %277  ;;  %v101_v44 = vmul.f32 %v276_v42, %v92_v40  ;;  %vm106_vm6 = vweird.f32 %v276_v42 }
  0xb4   :  { %v116_v45 = vmul.f32 %v278_v43, %v99_v41  ;;  %vm121_vm2 = vweird.f32 %v278_v43  ;;  %vm107_vm8 = vmor %vm105_vm7, %vm106_vm6 }
  0xb5   :  { %v102_v46 = vsub.f32 1.0, %v101_v44  ;;  %vm122_vm4 = vmor %vm120_vm3, %vm121_vm2 }
  0xb6   :  { %v117_v47 = vsub.f32 1.0, %v116_v45 }
  0xb7   :  { %v103_v51 = vmul.f32 %v276_v42, %v102_v46 }
  0xb8   :  { %v118_v49 = vmul.f32 %v278_v43, %v117_v47 }
  0xb9   :  { %v104_v55 = vadd.f32 %v276_v42, %v103_v51 }
  0xba   :  { %v119_v52 = vadd.f32 %v278_v43, %v118_v49 }
  0xbb   :  { %v108_v60 = vsel %vm107_vm8, %v276_v42, %v104_v55 }
  0xbc   :  { %v123_v54 = vsel %vm122_vm4, %v278_v43, %v119_v52  ;;  %v113_v62 = vsel %vm110_vm9, %v112_v61, %v108_v60 }
  0xbd   :  { %v128_v56 = vsel %vm125_vm5, %v127_v53, %v123_v54  ;;  %v114_v63 = vmul.f32 %v272_v26, %v113_v62 }
  0xbe   :  { %v129_v58 = vmul.f32 %v274_v27, %v128_v56 }
  0xc0   :  { %186 = vxpose.xlu0.b32.start.end [1/1] (short) (narrow) %v129_v58, 8 }
  0xc8   :  { %130 = vxpose.xlu0.b32.start.end [1/1] (short) (narrow) %v114_v63, 8 }
 0x164   :  { %v202_v0 = vpop.trf.xlu0 }
 0x165   :  { %268 = vmatmul.msk.f32.vlgmr.msra.gmra.mxu3 %vm162_vm10, %v202_v0 }
 0x16c   :  { %v146_v1 = vpop.trf.xlu0 }
 0x16d   :  { %267 = vmatmul.msk.f32.vlgmr.msra.gmra.mxu2 %vm162_vm10, %v146_v1 }
 0x1e8   :  { %v238_v2 = vpop.f32.mrf.mxu3 }
 0x1e9   :  { %v243_v3 = vrot.slane %v238_v2, 7 }
 0x1f0   :  { %v183_v4 = vpop.f32.mrf.mxu2 }
 0x1f1   :  { %v245_v5 = vsel %vm244_vm11, %v243_v3, %v183_v4 }
 0x1f2   :  { %248 = vst.msk [vmem:[#allocation2] sm:$0x3] %vm247_vm12, %v245_v5 }
 0x1f3   :  { %259 = dma.vmem_to_hbm [thread:$0]  %s255_s1, 32, %s257_s23, [#allocation3]  }
 0x1f4   :  { %303 = dma.done.wait [#allocation3], 32  }
 0x1f5   :  { %304 = vsyncadd [#allocation3], 4294967264 }
 0x1f6   :  { %264 = vsyncpa [#allocation3], 1 }

</bundles_post_ra>
